<compile_context>
chip_gen: v6e
topology: v6e:2x2x1
jax: 0.10.0
libtpu: 0.0.40
codegen_flags: <defaults>
</compile_context>

<pallas_src>
import math
from functools import partial

import jax
import jax.numpy as jnp
from jax.experimental import pallas as pl
from jax.experimental.pallas import tpu as pltpu


# ---------------------------------------------------------------------------
# Fused Pallas kernel: whole BasicBlock for one image per grid step
# ---------------------------------------------------------------------------
def _basic_block_kernel(xp_ref, w1_ref, b1_ref, w2_ref, b2_ref, out_ref, yp_ref,
                        *, H, W, Cin, Cout):
    WC = W * Cout
    x = xp_ref[0]                                            # (Hp, Wp*Cin)

    # conv1 (+ folded BN1 scale): three row-shifted matmuls on banded weights.
    acc = jnp.dot(x[0:H, :], w1_ref[0], preferred_element_type=jnp.float32)
    acc += jnp.dot(x[1:1 + H, :], w1_ref[1], preferred_element_type=jnp.float32)
    acc += jnp.dot(x[2:2 + H, :], w1_ref[2], preferred_element_type=jnp.float32)
    y1 = jnp.maximum(acc + b1_ref[...], 0.0)                 # f32, (H, W*Cout)

    # Keep the intermediate activation entirely in VMEM, zero-padded for conv2.
    yp_ref[...] = jnp.zeros_like(yp_ref)
    yp_ref[1:1 + H, Cout:Cout + WC] = y1.astype(yp_ref.dtype)
    yp = yp_ref[...]                                         # (Hp, Wp*Cout)

    # conv2 (+ folded BN2 scale)
    acc2 = jnp.dot(yp[0:H, :], w2_ref[0], preferred_element_type=jnp.float32)
    acc2 += jnp.dot(yp[1:1 + H, :], w2_ref[1], preferred_element_type=jnp.float32)
    acc2 += jnp.dot(yp[2:2 + H, :], w2_ref[2], preferred_element_type=jnp.float32)

    # Residual: sliced straight from the padded input tile already in VMEM.
    res = x[1:1 + H, Cin:Cin + W * Cin].astype(jnp.float32)
    out_ref[0] = jnp.maximum(acc2 + b2_ref[...] + res, 0.0).astype(out_ref.dtype)


# ---------------------------------------------------------------------------
# Wrapper-side parameter transforms (cheap, done once per call)
# ---------------------------------------------------------------------------
def _fold_bn(bn, eps=1e-5):
    scale = bn["gamma"] / jnp.sqrt(bn["var"] + eps)
    bias = bn["beta"] - bn["mean"] * scale
    return scale, bias


def _banded_weights(w_oihw, scale, W_out, pad=1):
    """PyTorch (O,I,3,3) weight (+ folded BN scale) -> (KH, Wp*I, W_out*O) banded mats.

    T[kh, wp*I + i, w*O + o] = W[o, i, kh, wp - w] * scale[o]  (0 <= wp-w < KW)
    so the conv over (kw, i) becomes a single matmul per vertical tap kh.
    """
    O, I, KH, KW = w_oihw.shape
    Wp = W_out + 2 * pad
    wk = jnp.transpose(w_oihw, (2, 3, 1, 0)) * scale[None, None, None, :]  # (KH,KW,I,O)
    band = (jnp.arange(Wp)[None, None, :] ==
            (jnp.arange(W_out)[None, :, None] + jnp.arange(KW)[:, None, None]))
    band = band.astype(wk.dtype)                                           # (KW,W,Wp)
    T = jnp.einsum('xwp,hxio->hpiwo', band, wk)                            # (KH,Wp,I,W,O)
    return T.reshape(KH, Wp * I, W_out * O)


# ---------------------------------------------------------------------------
# Forward (PyTorch-facing NCHW API)
# ---------------------------------------------------------------------------
def basic_block_forward(x_nchw, params, *, compute_dtype=jnp.float32):
    N, Cin, H, W = x_nchw.shape
    Cout = params["w1"].shape[0]
    assert params["w1"].shape == (Cout, Cin, 3, 3)
    assert params["w2"].shape == (Cout, Cout, 3, 3)
    assert Cin == Cout, "identity residual requires inplanes == planes (no downsample)"

    Hp, Wp = H + 2, W + 2

    # NCHW -> padded NHWC, flattened to a 2-D (rows=Hp, lanes=Wp*C) slab per image.
    x_nhwc = jnp.transpose(x_nchw, (0, 2, 3, 1)).astype(jnp.float32)
    xp = jnp.pad(x_nhwc, ((0, 0), (1, 1), (1, 1), (0, 0)))
    xp = xp.reshape(N, Hp, Wp * Cin).astype(compute_dtype)

    # Fold BN scale into the banded weight matrices; keep the bias for the kernel.
    s1, b1 = _fold_bn(params["bn1"])
    s2, b2 = _fold_bn(params["bn2"])
    w1t = _banded_weights(params["w1"], s1, W).astype(compute_dtype)  # (3, Wp*Cin, W*Cout)
    w2t = _banded_weights(params["w2"], s2, W).astype(compute_dtype)  # (3, Wp*Cout, W*Cout)
    b1r = jnp.tile(b1, W).reshape(1, W * Cout).astype(jnp.float32)
    b2r = jnp.tile(b2, W).reshape(1, W * Cout).astype(jnp.float32)

    kernel = partial(_basic_block_kernel, H=H, W=W, Cin=Cin, Cout=Cout)

    out = pl.pallas_call(
        kernel,
        out_shape=jax.ShapeDtypeStruct((N, H, W * Cout), jnp.float32),
        grid=(N,),
        in_specs=[
            pl.BlockSpec((1, Hp, Wp * Cin), lambda n: (n, 0, 0)),
            pl.BlockSpec((3, Wp * Cin, W * Cout), lambda n: (0, 0, 0)),
            pl.BlockSpec((1, W * Cout), lambda n: (0, 0)),
            pl.BlockSpec((3, Wp * Cout, W * Cout), lambda n: (0, 0, 0)),
            pl.BlockSpec((1, W * Cout), lambda n: (0, 0)),
        ],
        out_specs=pl.BlockSpec((1, H, W * Cout), lambda n: (n, 0, 0)),
        scratch_shapes=[pltpu.VMEM((Hp, Wp * Cout), compute_dtype)],
        compiler_params=pltpu.CompilerParams(
            dimension_semantics=("parallel",)),
    )(xp, w1t, b1r, w2t, b2r)

    out = out.reshape(N, H, W, Cout)
    return jnp.transpose(out, (0, 3, 1, 2))                  # back to NCHW


# ---------------------------------------------------------------------------
# Pure-JAX reference (correctness check only)
# ---------------------------------------------------------------------------
def reference_forward(x_nchw, params, eps=1e-5):
    x = jnp.transpose(x_nchw, (0, 2, 3, 1)).astype(jnp.float32)

    def conv(y, w_oihw):
        w_hwio = jnp.transpose(w_oihw, (2, 3, 1, 0))
        return jax.lax.conv_general_dilated(
            y, w_hwio, (1, 1), "SAME",
            dimension_numbers=("NHWC", "HWIO", "NHWC"))

    def bn(y, p):
        return (y - p["mean"]) / jnp.sqrt(p["var"] + eps) * p["gamma"] + p["beta"]

    y = jax.nn.relu(bn(conv(x, params["w1"]), params["bn1"]))
    y = bn(conv(y, params["w2"]), params["bn2"]) + x
    y = jax.nn.relu(y)
    return jnp.transpose(y, (0, 3, 1, 2))


# ---------------------------------------------------------------------------
# Deterministic parameter construction
# ---------------------------------------------------------------------------
def make_params(key, inplanes, planes):
    ks = jax.random.split(key, 10)
    std1 = math.sqrt(2.0 / (9 * inplanes))
    std2 = math.sqrt(2.0 / (9 * planes))
    return {
        "w1": std1 * jax.random.normal(ks[0], (planes, inplanes, 3, 3), jnp.float32),
        "w2": std2 * jax.random.normal(ks[1], (planes, planes, 3, 3), jnp.float32),
        "bn1": {
            "gamma": 1.0 + 0.1 * jax.random.normal(ks[2], (planes,), jnp.float32),
            "beta": 0.1 * jax.random.normal(ks[3], (planes,), jnp.float32),
            "mean": 0.1 * jax.random.normal(ks[4], (planes,), jnp.float32),
            "var": jax.random.uniform(ks[5], (planes,), jnp.float32, 0.5, 1.5),
        },
        "bn2": {
            "gamma": 1.0 + 0.1 * jax.random.normal(ks[6], (planes,), jnp.float32),
            "beta": 0.1 * jax.random.normal(ks[7], (planes,), jnp.float32),
            "mean": 0.1 * jax.random.normal(ks[8], (planes,), jnp.float32),
            "var": jax.random.uniform(ks[9], (planes,), jnp.float32, 0.5, 1.5),
        },
    }


# ---------------------------------------------------------------------------
if __name__ == "__main__":
    key = jax.random.PRNGKey(0)
    k_x, k_p = jax.random.split(key)

    N, C, H, W = 2, 4, 16, 16          # inplanes = planes = 4, stride = 1
    x = jax.random.normal(k_x, (N, C, H, W), jnp.float32)
    params = make_params(k_p, inplanes=C, planes=C)

    fwd = jax.jit(basic_block_forward)
    out = jax.block_until_ready(fwd(x, params))

    ref = jax.block_until_ready(reference_forward(x, params))
    assert out.shape == (N, C, H, W)
    assert jnp.allclose(out, ref, rtol=1e-2, atol=1e-2), "mismatch vs reference"

    print("KERNEL_OK")
</pallas_src>

<mosaic_0001>
module attributes {stable_mosaic.version = 11 : i64} {
  func.func @_basic_block_kernel(%arg0: i32, %arg1: memref<1x18x72xf32, #tpu.memory_space<vmem>>, %arg2: memref<3x72x64xf32, #tpu.memory_space<vmem>>, %arg3: memref<1x64xf32, #tpu.memory_space<vmem>>, %arg4: memref<3x72x64xf32, #tpu.memory_space<vmem>>, %arg5: memref<1x64xf32, #tpu.memory_space<vmem>>, %arg6: memref<1x16x64xf32, #tpu.memory_space<vmem>>, %arg7: memref<18x72xf32, #tpu.memory_space<vmem>>) attributes {dimension_semantics = [#tpu.dimension_semantics<parallel>], iteration_bounds = array<i64: 2>, scalar_prefetch = 0 : i64, scratch_operands = 1 : i64, tpu.core_type = #tpu.core_type<tc>, window_params = [{transform_indices = @transform_0, window_bounds = array<i64: 1, 18, 72>}, {pipeline_mode = #tpu.pipeline_mode<synchronous>, transform_indices = @transform_1, window_bounds = array<i64: 3, 72, 64>}, {pipeline_mode = #tpu.pipeline_mode<synchronous>, transform_indices = @transform_2, window_bounds = array<i64: 1, 64>}, {pipeline_mode = #tpu.pipeline_mode<synchronous>, transform_indices = @transform_3, window_bounds = array<i64: 3, 72, 64>}, {pipeline_mode = #tpu.pipeline_mode<synchronous>, transform_indices = @transform_4, window_bounds = array<i64: 1, 64>}, {transform_indices = @transform_5, window_bounds = array<i64: 1, 16, 64>}]} {
    %c0 = arith.constant 0 : index
    %c0_0 = arith.constant 0 : index
    %c0_1 = arith.constant 0 : index
    %0 = vector.load %arg1[%c0, %c0_0, %c0_1] : memref<1x18x72xf32, #tpu.memory_space<vmem>>, vector<1x18x72xf32>
    %1 = vector.shape_cast %0 : vector<1x18x72xf32> to vector<18x72xf32>
    %2 = vector.extract_strided_slice %1 {offsets = [0, 0], sizes = [16, 72], strides = [1, 1]} : vector<18x72xf32> to vector<16x72xf32>
    %c0_2 = arith.constant 0 : index
    %c0_3 = arith.constant 0 : index
    %c0_4 = arith.constant 0 : index
    %3 = vector.load %arg2[%c0_2, %c0_3, %c0_4] : memref<3x72x64xf32, #tpu.memory_space<vmem>>, vector<1x72x64xf32>
    %4 = vector.shape_cast %3 : vector<1x72x64xf32> to vector<72x64xf32>
    %cst = arith.constant dense<0.000000e+00> : vector<16x64xf32>
    %5 = tpu.matmul %2, %4, %cst {dimension_numbers = #tpu.dot_dimension_numbers<[1], [0], [0], [1], [0, 0, 1, 1], [], []>} : vector<16x72xf32>, vector<72x64xf32>, vector<16x64xf32> -> vector<16x64xf32>
    %6 = vector.extract_strided_slice %1 {offsets = [1, 0], sizes = [16, 72], strides = [1, 1]} : vector<18x72xf32> to vector<16x72xf32>
    %c1 = arith.constant 1 : index
    %c0_5 = arith.constant 0 : index
    %c0_6 = arith.constant 0 : index
    %7 = vector.load %arg2[%c1, %c0_5, %c0_6] : memref<3x72x64xf32, #tpu.memory_space<vmem>>, vector<1x72x64xf32>
    %8 = vector.shape_cast %7 : vector<1x72x64xf32> to vector<72x64xf32>
    %cst_7 = arith.constant dense<0.000000e+00> : vector<16x64xf32>
    %9 = tpu.matmul %6, %8, %cst_7 {dimension_numbers = #tpu.dot_dimension_numbers<[1], [0], [0], [1], [0, 0, 1, 1], [], []>} : vector<16x72xf32>, vector<72x64xf32>, vector<16x64xf32> -> vector<16x64xf32>
    %10 = arith.addf %5, %9 : vector<16x64xf32>
    %11 = vector.extract_strided_slice %1 {offsets = [2, 0], sizes = [16, 72], strides = [1, 1]} : vector<18x72xf32> to vector<16x72xf32>
    %c2 = arith.constant 2 : index
    %c0_8 = arith.constant 0 : index
    %c0_9 = arith.constant 0 : index
    %12 = vector.load %arg2[%c2, %c0_8, %c0_9] : memref<3x72x64xf32, #tpu.memory_space<vmem>>, vector<1x72x64xf32>
    %13 = vector.shape_cast %12 : vector<1x72x64xf32> to vector<72x64xf32>
    %cst_10 = arith.constant dense<0.000000e+00> : vector<16x64xf32>
    %14 = tpu.matmul %11, %13, %cst_10 {dimension_numbers = #tpu.dot_dimension_numbers<[1], [0], [0], [1], [0, 0, 1, 1], [], []>} : vector<16x72xf32>, vector<72x64xf32>, vector<16x64xf32> -> vector<16x64xf32>
    %15 = arith.addf %10, %14 : vector<16x64xf32>
    %c0_11 = arith.constant 0 : index
    %c0_12 = arith.constant 0 : index
    %16 = vector.load %arg3[%c0_11, %c0_12] : memref<1x64xf32, #tpu.memory_space<vmem>>, vector<1x64xf32>
    %17 = vector.broadcast %16 : vector<1x64xf32> to vector<16x64xf32>
    %18 = arith.addf %15, %17 : vector<16x64xf32>
    %cst_13 = arith.constant 0.000000e+00 : f32
    %19 = vector.broadcast %cst_13 : f32 to vector<16x64xf32>
    %20 = arith.maximumf %18, %19 : vector<16x64xf32>
    %cst_14 = arith.constant 0.000000e+00 : f32
    %21 = vector.broadcast %cst_14 : f32 to vector<18x72xf32>
    %c0_15 = arith.constant 0 : index
    %c0_16 = arith.constant 0 : index
    %22 = vector.load %arg7[%c0_15, %c0_16] : memref<18x72xf32, #tpu.memory_space<vmem>>, vector<18x72xf32>
    tpu.vector_store %arg7[%c0_15, %c0_16], %21 {strides = array<i32>} : memref<18x72xf32, #tpu.memory_space<vmem>>, vector<18x72xf32>,
    %c1_17 = arith.constant 1 : index
    %c4 = arith.constant 4 : index
    %23 = vector.load %arg7[%c1_17, %c4] : memref<18x72xf32, #tpu.memory_space<vmem>>, vector<16x64xf32>
    tpu.vector_store %arg7[%c1_17, %c4], %20 {strides = array<i32>} : memref<18x72xf32, #tpu.memory_space<vmem>>, vector<16x64xf32>,
    %c0_18 = arith.constant 0 : index
    %c0_19 = arith.constant 0 : index
    %24 = vector.load %arg7[%c0_18, %c0_19] : memref<18x72xf32, #tpu.memory_space<vmem>>, vector<18x72xf32>
    %25 = vector.extract_strided_slice %24 {offsets = [0, 0], sizes = [16, 72], strides = [1, 1]} : vector<18x72xf32> to vector<16x72xf32>
    %c0_20 = arith.constant 0 : index
    %c0_21 = arith.constant 0 : index
    %c0_22 = arith.constant 0 : index
    %26 = vector.load %arg4[%c0_20, %c0_21, %c0_22] : memref<3x72x64xf32, #tpu.memory_space<vmem>>, vector<1x72x64xf32>
    %27 = vector.shape_cast %26 : vector<1x72x64xf32> to vector<72x64xf32>
    %cst_23 = arith.constant dense<0.000000e+00> : vector<16x64xf32>
    %28 = tpu.matmul %25, %27, %cst_23 {dimension_numbers = #tpu.dot_dimension_numbers<[1], [0], [0], [1], [0, 0, 1, 1], [], []>} : vector<16x72xf32>, vector<72x64xf32>, vector<16x64xf32> -> vector<16x64xf32>
    %29 = vector.extract_strided_slice %24 {offsets = [1, 0], sizes = [16, 72], strides = [1, 1]} : vector<18x72xf32> to vector<16x72xf32>
    %c1_24 = arith.constant 1 : index
    %c0_25 = arith.constant 0 : index
    %c0_26 = arith.constant 0 : index
    %30 = vector.load %arg4[%c1_24, %c0_25, %c0_26] : memref<3x72x64xf32, #tpu.memory_space<vmem>>, vector<1x72x64xf32>
    %31 = vector.shape_cast %30 : vector<1x72x64xf32> to vector<72x64xf32>
    %cst_27 = arith.constant dense<0.000000e+00> : vector<16x64xf32>
    %32 = tpu.matmul %29, %31, %cst_27 {dimension_numbers = #tpu.dot_dimension_numbers<[1], [0], [0], [1], [0, 0, 1, 1], [], []>} : vector<16x72xf32>, vector<72x64xf32>, vector<16x64xf32> -> vector<16x64xf32>
    %33 = arith.addf %28, %32 : vector<16x64xf32>
    %34 = vector.extract_strided_slice %24 {offsets = [2, 0], sizes = [16, 72], strides = [1, 1]} : vector<18x72xf32> to vector<16x72xf32>
    %c2_28 = arith.constant 2 : index
    %c0_29 = arith.constant 0 : index
    %c0_30 = arith.constant 0 : index
    %35 = vector.load %arg4[%c2_28, %c0_29, %c0_30] : memref<3x72x64xf32, #tpu.memory_space<vmem>>, vector<1x72x64xf32>
    %36 = vector.shape_cast %35 : vector<1x72x64xf32> to vector<72x64xf32>
    %cst_31 = arith.constant dense<0.000000e+00> : vector<16x64xf32>
    %37 = tpu.matmul %34, %36, %cst_31 {dimension_numbers = #tpu.dot_dimension_numbers<[1], [0], [0], [1], [0, 0, 1, 1], [], []>} : vector<16x72xf32>, vector<72x64xf32>, vector<16x64xf32> -> vector<16x64xf32>
    %38 = arith.addf %33, %37 : vector<16x64xf32>
    %39 = vector.extract_strided_slice %1 {offsets = [1, 4], sizes = [16, 64], strides = [1, 1]} : vector<18x72xf32> to vector<16x64xf32>
    %c0_32 = arith.constant 0 : index
    %c0_33 = arith.constant 0 : index
    %40 = vector.load %arg5[%c0_32, %c0_33] : memref<1x64xf32, #tpu.memory_space<vmem>>, vector<1x64xf32>
    %41 = vector.broadcast %40 : vector<1x64xf32> to vector<16x64xf32>
    %42 = arith.addf %38, %41 : vector<16x64xf32>
    %43 = arith.addf %42, %39 : vector<16x64xf32>
    %cst_34 = arith.constant 0.000000e+00 : f32
    %44 = vector.broadcast %cst_34 : f32 to vector<16x64xf32>
    %45 = arith.maximumf %43, %44 : vector<16x64xf32>
    %c0_35 = arith.constant 0 : index
    %c0_36 = arith.constant 0 : index
    %c0_37 = arith.constant 0 : index
    %46 = vector.load %arg6[%c0_35, %c0_36, %c0_37] : memref<1x16x64xf32, #tpu.memory_space<vmem>>, vector<1x16x64xf32>
    %47 = vector.shape_cast %46 : vector<1x16x64xf32> to vector<16x64xf32>
    %48 = vector.shape_cast %45 : vector<16x64xf32> to vector<1x16x64xf32>
    tpu.vector_store %arg6[%c0_35, %c0_36, %c0_37], %48 {strides = array<i32>} : memref<1x16x64xf32, #tpu.memory_space<vmem>>, vector<1x16x64xf32>,
    return
  }
  func.func @transform_0(%arg0: i32) -> (i32, i32, i32) {
    %c0_i32 = arith.constant 0 : i32
    %c0_i32_0 = arith.constant 0 : i32
    %c0_i32_1 = arith.constant 0 : i32
    return %arg0, %c0_i32, %c0_i32_0 : i32, i32, i32
  }
  func.func @transform_1(%arg0: i32) -> (i32, i32, i32) {
    %c0_i32 = arith.constant 0 : i32
    %c0_i32_0 = arith.constant 0 : i32
    %c0_i32_1 = arith.constant 0 : i32
    %c0_i32_2 = arith.constant 0 : i32
    return %c0_i32, %c0_i32_0, %c0_i32_1 : i32, i32, i32
  }
  func.func @transform_2(%arg0: i32) -> (i32, i32) {
    %c0_i32 = arith.constant 0 : i32
    %c0_i32_0 = arith.constant 0 : i32
    %c0_i32_1 = arith.constant 0 : i32
    return %c0_i32, %c0_i32_0 : i32, i32
  }
  func.func @transform_3(%arg0: i32) -> (i32, i32, i32) {
    %c0_i32 = arith.constant 0 : i32
    %c0_i32_0 = arith.constant 0 : i32
    %c0_i32_1 = arith.constant 0 : i32
    %c0_i32_2 = arith.constant 0 : i32
    return %c0_i32, %c0_i32_0, %c0_i32_1 : i32, i32, i32
  }
  func.func @transform_4(%arg0: i32) -> (i32, i32) {
    %c0_i32 = arith.constant 0 : i32
    %c0_i32_0 = arith.constant 0 : i32
    %c0_i32_1 = arith.constant 0 : i32
    return %c0_i32, %c0_i32_0 : i32, i32
  }
  func.func @transform_5(%arg0: i32) -> (i32, i32, i32) {
    %c0_i32 = arith.constant 0 : i32
    %c0_i32_0 = arith.constant 0 : i32
    %c0_i32_1 = arith.constant 0 : i32
    return %arg0, %c0_i32, %c0_i32_0 : i32, i32, i32
  }
}

</mosaic_0001>

<bundles_post_ra>
// kernel: tile.13
= control target key start
LH: loop header
LB: loop body
LE: loop exit
PB: predicated region body
PF: predicated region fallthrough
CT: control target
= control target key end

     0   :  { %s28_s0 = inlined_call_operand.vmem [shape: f32[4], index: 0, kind: input, shape index: {}]   ;;  %s29_s1 = inlined_call_operand.vmem [shape: f32[16,4], index: 1, kind: output, shape index: {}]  }
   0x1   :  { %v4_v0 = vld [vmem:[%s28_s0] ss:$0 sm:$0xff] }
   0x2   :  { %5 = vst [vmem:[%s29_s1] sm:$0xff] %v4_v0  ;;  %8 = vst [vmem:[%s29_s1 + $0x8] sm:$0xff] %v4_v0 }

// kernel: tile.14
= control target key start
LH: loop header
LB: loop body
LE: loop exit
PB: predicated region body
PF: predicated region fallthrough
CT: control target
= control target key end

     0   :  { %s133_s10 = smov 60   ;;  %s134_s11 = smov 52   ;;  %vm3_vm0 = vcmask 31744   ;;  %vm9_vm1 = vcmask 523744   ;;  %vm15_vm2 = vcmask 490944   ;;  %vm21_vm3 = vcmask 458144   ;;  %s209_s0 = inlined_call_operand.vmem [shape: f32[16,4], index: 0, kind: input, shape index: {}]   ;;  %s210_s1 = inlined_call_operand.vmem [shape: f32[1,64], index: 1, kind: output, shape index: {}]  }
   0x1   :  { %v103_v0 = vld [vmem:[%s209_s0 + $0xf] sm:$0x1]   ;;  %v105_v1 = vld [vmem:[%s209_s0 + $0xd] sm:$0x1]   ;;  %v104_v2 = vld [vmem:[%s209_s0 + $0xe] sm:$0x1]  }
   0x2   :  { %7 = vrot.lane.b32.xlu0 %v103_v0, %s133_s10  ;;  %19 = vrot.lane.b32.xlu1 %v105_v1, %s134_s11  ;;  %v106_v3 = vld [vmem:[%s209_s0 + $0xc] sm:$0x1]   ;;  %s135_s16 = smov 56   ;;  %s136_s17 = smov 48   ;;  %v107_v4 = vld [vmem:[%s209_s0 + $0xb] sm:$0x1]  }
   0x3   :  { %v108_v5 = vld [vmem:[%s209_s0 + $0xa] sm:$0x1]   ;;  %v2_v6 = vld [vmem:[%s209_s0] sm:$0x1]   ;;  %s137_s24 = smov 44   ;;  %s138_s25 = smov 40  }
   0x4   :  { %4 = vst.msk [vmem:[#allocation0] sm:$0x1] %vm3_vm0, %v2_v6   ;;  %v109_v7 = vld [vmem:[%s209_s0 + $0x9] sm:$0x1]   ;;  %v110_v8 = vld [vmem:[%s209_s0 + $0x8] sm:$0x1]  }
   0x5   :  { %s139_s30 = smov 36   ;;  %s140_s2 = smov 32   ;;  %v111_v9 = vld [vmem:[%s209_s0 + $0x7] sm:$0x1]   ;;  %v112_v10 = vld [vmem:[%s209_s0 + $0x6] sm:$0x1]  }
   0x6   :  { %13 = vrot.lane.b32.xlu0 %v104_v2, %s135_s16  ;;  %25 = vrot.lane.b32.xlu1 %v106_v3, %s136_s17  ;;  %s141_s7 = smov 28   ;;  %s142_s8 = smov 24   ;;  %v113_v11 = vld [vmem:[%s209_s0 + $0x5] sm:$0x1]   ;;  %v114_v12 = vld [vmem:[%s209_s0 + $0x4] sm:$0x1]  }
   0x7   :  { %s143_s13 = smov 20   ;;  %s144_s14 = smov 16   ;;  %v115_v13 = vld [vmem:[%s209_s0 + $0x3] sm:$0x1]   ;;  %v116_v14 = vld [vmem:[%s209_s0 + $0x2] sm:$0x1]  }
   0x8   :  { %s145_s19 = smov 12   ;;  %s146_s20 = smov 8   ;;  %v117_v15 = vld [vmem:[%s209_s0 + $0x1] sm:$0x1]   ;;  %vm27_vm4 = vcmask 425344   ;;  %vm33_vm5 = vcmask 392544  }
   0x9   :  { %s147_s0 = smov 4   ;;  %vm39_vm6 = vcmask 359744   ;;  %vm45_vm7 = vcmask 326944   ;;  %vm51_vm8 = vcmask 294144   ;;  %vm57_vm9 = vcmask 261344  }
   0xa   :  { %31 = vrot.lane.b32.xlu0 %v107_v4, %s137_s24  ;;  %37 = vrot.lane.b32.xlu1 %v108_v5, %s138_s25  ;;  %vm63_vm10 = vcmask 228544   ;;  %vm69_vm11 = vcmask 195744   ;;  %vm75_vm12 = vcmask 162944   ;;  %vm81_vm13 = vcmask 130144  }
   0xb   :  { %vm87_vm14 = vcmask 97344   ;;  %vm93_vm15 = vcmask 64544  }
   0xe   :  { %43 = vrot.lane.b32.xlu0 %v109_v7, %s139_s30  ;;  %49 = vrot.lane.b32.xlu1 %v110_v8, %s140_s2 }
  0x12   :  { %55 = vrot.lane.b32.xlu0 %v111_v9, %s141_s7  ;;  %61 = vrot.lane.b32.xlu1 %v112_v10, %s142_s8 }
  0x16   :  { %67 = vrot.lane.b32.xlu0 %v113_v11, %s143_s13  ;;  %73 = vrot.lane.b32.xlu1 %v114_v12, %s144_s14 }
  0x1a   :  { %79 = vrot.lane.b32.xlu0 %v115_v13, %s145_s19  ;;  %85 = vrot.lane.b32.xlu1 %v116_v14, %s146_s20 }
  0x1e   :  { %91 = vrot.lane.b32.xlu0 %v117_v15, %s147_s0 }
  0x74   :  { %v8_v16 = vpop.permute.xlu0 %7   ;;  %v20_v17 = vpop.permute.xlu1 %19  }
  0x75   :  { %10 = vst.msk [vmem:[#allocation0] sm:$0x1] %vm9_vm1, %v8_v16  }
  0x78   :  { %v14_v18 = vpop.permute.xlu0 %13   ;;  %v26_v19 = vpop.permute.xlu1 %25  }
  0x79   :  { %16 = vst.msk [vmem:[#allocation0] sm:$0x1] %vm15_vm2, %v14_v18  }
  0x7a   :  { %22 = vst.msk [vmem:[#allocation0] sm:$0x1] %vm21_vm3, %v20_v17  }
  0x7b   :  { %28 = vst.msk [vmem:[#allocation0] sm:$0x1] %vm27_vm4, %v26_v19  }
  0x7c   :  { %v32_v20 = vpop.permute.xlu0 %31   ;;  %v38_v21 = vpop.permute.xlu1 %37  }
  0x7d   :  { %34 = vst.msk [vmem:[#allocation0] sm:$0x1] %vm33_vm5, %v32_v20  }
  0x7e   :  { %40 = vst.msk [vmem:[#allocation0] sm:$0x1] %vm39_vm6, %v38_v21  }
  0x80   :  { %v44_v22 = vpop.permute.xlu0 %43   ;;  %v50_v23 = vpop.permute.xlu1 %49  }
  0x81   :  { %46 = vst.msk [vmem:[#allocation0] sm:$0x1] %vm45_vm7, %v44_v22  }
  0x82   :  { %52 = vst.msk [vmem:[#allocation0] sm:$0x1] %vm51_vm8, %v50_v23  }
  0x84   :  { %v56_v24 = vpop.permute.xlu0 %55   ;;  %v62_v25 = vpop.permute.xlu1 %61  }
  0x85   :  { %58 = vst.msk [vmem:[#allocation0] sm:$0x1] %vm57_vm9, %v56_v24  }
  0x86   :  { %64 = vst.msk [vmem:[#allocation0] sm:$0x1] %vm63_vm10, %v62_v25  }
  0x88   :  { %v68_v26 = vpop.permute.xlu0 %67   ;;  %v74_v27 = vpop.permute.xlu1 %73  }
  0x89   :  { %70 = vst.msk [vmem:[#allocation0] sm:$0x1] %vm69_vm11, %v68_v26  }
  0x8a   :  { %76 = vst.msk [vmem:[#allocation0] sm:$0x1] %vm75_vm12, %v74_v27  }
  0x8c   :  { %v80_v28 = vpop.permute.xlu0 %79   ;;  %v86_v29 = vpop.permute.xlu1 %85  }
  0x8d   :  { %82 = vst.msk [vmem:[#allocation0] sm:$0x1] %vm81_vm13, %v80_v28  }
  0x8e   :  { %88 = vst.msk [vmem:[#allocation0] sm:$0x1] %vm87_vm14, %v86_v29  }
  0x90   :  { %v92_v30 = vpop.permute.xlu0 %91  }
  0x91   :  { %94 = vst.msk [vmem:[#allocation0] sm:$0x1] %vm93_vm15, %v92_v30  }
  0x98   :  { %v99_v31 = vld [vmem:[#allocation0] sm:$0x1] }
  0x99   :  { %102 = vst [vmem:[%s210_s1] sm:$0x1] %v99_v31 }

// kernel: basic_block_forward.1
= control target key start
LH: loop header
LB: loop body
LE: loop exit
PB: predicated region body
PF: predicated region fallthrough
CT: control target
= control target key end

     0   :  { %s1205_s18 = smov 0   ;;  %s1433_s0 = inlined_call_operand.vmem [shape: f32[2,18,72], index: 0, kind: input, shape index: {}]   ;;  %s1434_s1 = inlined_call_operand.vmem [shape: f32[3,72,64], index: 1, kind: input, shape index: {}]   ;;  %s1435_s2 = inlined_call_operand.vmem [shape: f32[1,64], index: 2, kind: input, shape index: {}]   ;;  %s1436_s3 = inlined_call_operand.vmem [shape: f32[3,72,64], index: 3, kind: input, shape index: {}]   ;;  %s1437_s4 = inlined_call_operand.vmem [shape: f32[1,64], index: 4, kind: input, shape index: {}]   ;;  %s1438_s5 = inlined_call_operand.vmem [shape: f32[2,16,64], index: 5, kind: output, shape index: {}]  }
   0x1 LB: > { %s899_s19 = sadd.s32 4294967295, %s1170_s18   ;;  %p903_p0 = scmp.ge.s32.totalorder %s1170_s18, 1  ;;  %s1170_s18 = sphi %s1205_s18, %s15_s18  }
   0x2   : > { %p187_p1 = scmp.lt.s32.totalorder %s1170_s18, 3 }
   0x4   : > { %p188_p2 = pnand %p903_p0, %p187_p1 }
   0x5   : > { %p215_p3 = scmp.lt.s32.totalorder (!%p188_p2), %s899_s19, 1  ;;  %s1173_s24 = smov (!%p188_p2), 4  }
   0x6   : > { %191 = sbr.rel (%p188_p2) target bundleno = 604 (0x25c), region = 40  ;;  %s1174_s27 = smov (!%p188_p2), 124  }
   0xb   : > { %v915_v0 = vld [vmem:[%s1434_s1 + $0x88] sm:$0xff]  ;;  %v236_v1 = vld [vmem:[%s1434_s1 + $0x40] sm:$0xff]  ;;  %v235_v3 = vld [vmem:[%s1434_s1 + $0x38] sm:$0xff]  ;;  %s1440_s19 = smov (!%p215_p3, %s899_s19), 1  ;;  %vm250_vm0 = vcmask 1046528   ;;  %vm256_vm1 = vcmask 588800  }
   0xc   : > { %v914_v2 = vld [vmem:[%s1434_s1 + $0x80] sm:$0xff]  ;;  %1026 = vmatprep.subr.mxu0 %v915_v0  ;;  %1047 = vmatprep.subr.mxu1 %v236_v1  ;;  %v913_v4 = vld [vmem:[%s1434_s1 + $0x78] sm:$0xff]  ;;  %v234_v5 = vld [vmem:[%s1434_s1 + $0x30] sm:$0xff]  ;;  %s1152_s11 = smul.u32 24, %s1440_s19  ;;  %vm425_vm2 = vcmask 1045504   ;;  %v1172_v44 = vmov 0.0  }
   0xd   : > { %1027 = vmatpush3.msra.mxu0 %v915_v0  ;;  %1048 = vmatpush3.msra.mxu1 %v236_v1  ;;  %v912_v6 = vld [vmem:[%s1434_s1 + $0x70] sm:$0xff]  ;;  %v233_v7 = vld [vmem:[%s1434_s1 + $0x28] sm:$0xff]  ;;  %v232_v9 = vld [vmem:[%s1434_s1 + $0x20] sm:$0xff]  ;;  %523 = vst.msk [vmem:[#allocation2] sm:$0xff] %vm256_vm1, %v1172_v44  ;;  %vm525_vm3 = vcmask 582656   ;;  %vm535_vm4 = vcmask 556064  }
   0xe   : > { %1028 = vmatprep.subr.mxu0 %v914_v2  ;;  %1049 = vmatprep.subr.mxu1 %v235_v3  ;;  %v911_v8 = vld [vmem:[%s1434_s1 + $0x68] sm:$0xff]  ;;  %s219_s20 = scalar_lea.vmem %s1433_s0, %s1152_s11  ;;  %v910_v10 = vld [vmem:[%s1434_s1 + $0x60] sm:$0xff]  ;;  %v231_v11 = vld [vmem:[%s1434_s1 + $0x18] sm:$0xff]  ;;  %524 = vst.msk [vmem:[#allocation2 + $0x8] sm:$0xff] %vm256_vm1, %v1172_v44  ;;  %s959_s23 = sshll.u32 %s1440_s19, 4  ;;  %vm841_vm5 = vcmask 523264  }
   0xf   : > { %1029 = vmatpush3.msra.mxu0 %v914_v2  ;;  %1050 = vmatpush3.msra.mxu1 %v235_v3  ;;  %v225_v12 = vld [vmem:[%s219_s20] sm:$0xff]  ;;  %v1255_v13 = vld [vmem:[%s219_s20 + $0x8] sm:$0xff]  ;;  %v909_v14 = vld [vmem:[%s1434_s1 + $0x58] sm:$0xff]  ;;  %526 = vst.msk [vmem:[#allocation2 + $0x10] sm:$0x3] %vm525_vm3, %v1172_v44  ;;  %s224_s26 = scalar_lea.vmem %s1438_s5, %s959_s23 }
  0x10   : > { %1030 = vmatprep.subr.mxu0 %v913_v4  ;;  %1051 = vmatprep.subr.mxu1 %v234_v5  ;;  %v230_v15 = vld [vmem:[%s1434_s1 + $0x10] sm:$0xff]  ;;  %v251_v17 = vrot.slane %v225_v12, 1  ;;  %v252_v18 = vrot.slane %v1255_v13, 1  ;;  %v229_v20 = vld [vmem:[%s1434_s1 + $0x8] sm:$0xff]  ;;  %v228_v23 = vld [vmem:[%s1434_s1] sm:$0xff]  ;;  %v426_v24 = vrot.slane %v225_v12, 2 }
  0x11   : > { %1031 = vmatpush3.msra.mxu0 %v913_v4  ;;  %1052 = vmatpush3.msra.mxu1 %v234_v5  ;;  %v1263_v16 = vld [vmem:[%s219_s20 + $0x10] sm:$0x3]  ;;  %v907_v22 = vld [vmem:[%s1434_s1 + $0x48] sm:$0xff]  ;;  %v427_v25 = vrot.slane %v1255_v13, 2  ;;  %v926_v31 = vld [vmem:[%s1434_s1 + $0xc0] sm:$0xff] }
  0x12   : > { %1032 = vmatprep.subr.mxu0 %v912_v6  ;;  %1053 = vmatprep.subr.mxu1 %v233_v7  ;;  %v908_v19 = vld [vmem:[%s1434_s1 + $0x50] sm:$0xff]  ;;  %v254_v21 = vrot.slane %v1263_v16, 1  ;;  %v1281_v26 = vsel %vm250_vm0, %v251_v17, %v252_v18  ;;  %v927_v30 = vld [vmem:[%s1434_s1 + $0xc8] sm:$0xff]  ;;  %v925_v32 = vld [vmem:[%s1434_s1 + $0xb8] sm:$0xff]  ;;  %v429_v36 = vrot.slane %v1263_v16, 2 }
  0x13   : > { %1033 = vmatpush3.msra.mxu0 %v912_v6  ;;  %1054 = vmatpush3.msra.mxu1 %v233_v7  ;;  %v928_v28 = vld [vmem:[%s1434_s1 + $0xd0] sm:$0xff]  ;;  %v428_v29 = vsel %vm425_vm2, %v426_v24, %v427_v25  ;;  %v923_v34 = vld [vmem:[%s1434_s1 + $0xa8] sm:$0xff]  ;;  %v922_v35 = vld [vmem:[%s1434_s1 + $0xa0] sm:$0xff] }
  0x14   : > { %1034 = vmatprep.subr.mxu0 %v911_v8  ;;  %1055 = vmatprep.subr.mxu1 %v232_v9  ;;  %v1284_v27 = vsel %vm250_vm0, %v252_v18, %v254_v21  ;;  %v924_v33 = vld [vmem:[%s1434_s1 + $0xb0] sm:$0xff]  ;;  %v921_v37 = vld [vmem:[%s1434_s1 + $0x98] sm:$0xff]  ;;  %v430_v39 = vsel %vm425_vm2, %v427_v25, %v429_v36  ;;  %v549_v40 = vld [vmem:[%s1436_s3 + $0x40] sm:$0xff] }
  0x15   : > { %1035 = vmatpush3.msra.mxu0 %v911_v8  ;;  %1056 = vmatpush3.msra.mxu1 %v232_v9  ;;  %v920_v38 = vld [vmem:[%s1434_s1 + $0x90] sm:$0xff]  ;;  %v548_v41 = vld [vmem:[%s1436_s3 + $0x38] sm:$0xff]  ;;  %v940_v42 = vld [vmem:[%s1436_s3 + $0x88] sm:$0xff] }
  0x16   : > { %1036 = vmatprep.subr.mxu0 %v910_v10  ;;  %1057 = vmatprep.subr.mxu1 %v231_v11  ;;  %v939_v43 = vld [vmem:[%s1436_s3 + $0x80] sm:$0xff]  ;;  %v547_v45 = vld [vmem:[%s1436_s3 + $0x30] sm:$0xff]  ;;  %v546_v48 = vld [vmem:[%s1436_s3 + $0x28] sm:$0xff] }
  0x17   : > { %1037 = vmatpush3.msra.mxu0 %v910_v10  ;;  %1058 = vmatpush3.msra.mxu1 %v231_v11  ;;  %v938_v49 = vld [vmem:[%s1436_s3 + $0x78] sm:$0xff]  ;;  %v545_v50 = vld [vmem:[%s1436_s3 + $0x20] sm:$0xff]  ;;  %v937_v51 = vld [vmem:[%s1436_s3 + $0x70] sm:$0xff] }
  0x18   : > { %1038 = vmatprep.subr.mxu0 %v909_v14  ;;  %1059 = vmatprep.subr.mxu1 %v230_v15  ;;  %v544_v54 = vld [vmem:[%s1436_s3 + $0x18] sm:$0xff]  ;;  %v936_v56 = vld [vmem:[%s1436_s3 + $0x68] sm:$0xff]  ;;  %v543_v57 = vld [vmem:[%s1436_s3 + $0x10] sm:$0xff] }
  0x19   : > { %1039 = vmatpush3.msra.mxu0 %v909_v14  ;;  %1060 = vmatpush3.msra.mxu1 %v230_v15  ;;  %v935_v58 = vld [vmem:[%s1436_s3 + $0x60] sm:$0xff]  ;;  %v542_v61 = vld [vmem:[%s1436_s3 + $0x8] sm:$0xff]  ;;  %v934_v2 = vld [vmem:[%s1436_s3 + $0x58] sm:$0xff] }
  0x1a   : > { %1040 = vmatprep.subr.mxu0 %v908_v19  ;;  %1061 = vmatprep.subr.mxu1 %v229_v20  ;;  %v931_v0 = vld [vmem:[%s1435_s2] ss:$0 sm:$0xff]  ;;  %v933_v4 = vld [vmem:[%s1436_s3 + $0x50] sm:$0xff]  ;;  %v932_v8 = vld [vmem:[%s1436_s3 + $0x48] sm:$0xff] }
  0x1b   : > { %1041 = vmatpush3.msra.mxu0 %v908_v19  ;;  %1062 = vmatpush3.msra.mxu1 %v229_v20  ;;  %v541_v3 = vld [vmem:[%s1436_s3] sm:$0xff]  ;;  %v953_v9 = vld [vmem:[%s1436_s3 + $0xd0] sm:$0xff] }
  0x1c   : > { %1042 = vmatprep.subr.mxu0 %v907_v22  ;;  %1063 = vmatprep.subr.mxu1 %v228_v23  ;;  %v951_v25 = vld [vmem:[%s1436_s3 + $0xc0] sm:$0xff] }
  0x1d   : > { %1043 = vmatpush3.msra.mxu0 %v907_v22  ;;  %1044 = vmatprep.mubr.msk.f32.mxu0 %vm256_vm1, %v1281_v26 }
  0x1e   : > { %1064 = vmatpush3.msra.mxu1 %v228_v23  ;;  %1065 = vmatprep.mubr.msk.f32.mxu1 %vm256_vm1, %v225_v12  ;;  %v952_v23 = vld [vmem:[%s1436_s3 + $0xc8] sm:$0xff] }
  0x1f   : > { %1045 = vmatmul.mubr.msk.f32.vlgmr.msra.gmra.mxu0 %vm256_vm1, %v1284_v27  ;;  %1066 = vmatmul.mubr.msk.f32.vlgmr.msra.gmra.mxu1 %vm256_vm1, %v1255_v13 }
  0x20   : > { %1068 = vmatprep.subr.mxu0 %v928_v28  ;;  %1086 = vmatprep.mubr.msk.f32.mxu0 %vm256_vm1, %v428_v29  ;;  %v947_v29 = vld [vmem:[%s1436_s3 + $0xa0] sm:$0xff] }
  0x21   : > { %1069 = vmatpush3.msra.mxu0 %v928_v28  ;;  %1089 = vmatprep.subr.mxu1 %v940_v42  ;;  %v948_v28 = vld [vmem:[%s1436_s3 + $0xa8] sm:$0xff] }
  0x22   : > { %1070 = vmatprep.subr.mxu0 %v927_v30  ;;  %1090 = vmatpush3.msra.mxu1 %v940_v42 }
  0x23   : > { %1071 = vmatpush3.msra.mxu0 %v927_v30  ;;  %1091 = vmatprep.subr.mxu1 %v939_v43  ;;  %v946_v30 = vld [vmem:[%s1436_s3 + $0x98] sm:$0xff] }
  0x24   : > { %1072 = vmatprep.subr.mxu0 %v926_v31  ;;  %1092 = vmatpush3.msra.mxu1 %v939_v43 }
  0x25   : > { %1073 = vmatpush3.msra.mxu0 %v926_v31  ;;  %1093 = vmatprep.subr.mxu1 %v938_v49  ;;  %v945_v31 = vld [vmem:[%s1436_s3 + $0x90] sm:$0xff] }
  0x26   : > { %1074 = vmatprep.subr.mxu0 %v925_v32  ;;  %1094 = vmatpush3.msra.mxu1 %v938_v49 }
  0x27   : > { %1075 = vmatpush3.msra.mxu0 %v925_v32  ;;  %1095 = vmatprep.subr.mxu1 %v937_v51 }
  0x28   : > { %1076 = vmatprep.subr.mxu0 %v924_v33  ;;  %1096 = vmatpush3.msra.mxu1 %v937_v51 }
  0x29   : > { %1077 = vmatpush3.msra.mxu0 %v924_v33  ;;  %1097 = vmatprep.subr.mxu1 %v936_v56 }
  0x2a   : > { %1078 = vmatprep.subr.mxu0 %v923_v34  ;;  %1098 = vmatpush3.msra.mxu1 %v936_v56 }
  0x2b   : > { %1079 = vmatpush3.msra.mxu0 %v923_v34  ;;  %1099 = vmatprep.subr.mxu1 %v935_v58 }
  0x2c   : > { %1080 = vmatprep.subr.mxu0 %v922_v35  ;;  %1100 = vmatpush3.msra.mxu1 %v935_v58 }
  0x2d   : > { %1081 = vmatpush3.msra.mxu0 %v922_v35  ;;  %1101 = vmatprep.subr.mxu1 %v934_v2 }
  0x2e   : > { %1082 = vmatprep.subr.mxu0 %v921_v37  ;;  %1102 = vmatpush3.msra.mxu1 %v934_v2 }
  0x2f   : > { %1083 = vmatpush3.msra.mxu0 %v921_v37  ;;  %1103 = vmatprep.subr.mxu1 %v933_v4 }
  0x30   : > { %1084 = vmatprep.subr.mxu0 %v920_v38  ;;  %1104 = vmatpush3.msra.mxu1 %v933_v4 }
  0x31   : > { %1085 = vmatpush3.msra.mxu0 %v920_v38  ;;  %1105 = vmatprep.subr.mxu1 %v932_v8 }
  0x32   : > { %1087 = vmatmul.mubr.msk.f32.vlgmr.msra.gmra.mxu0 %vm256_vm1, %v430_v39  ;;  %1110 = vmatprep.subr.mxu0 %v549_v40 }
  0x33   : > { %1111 = vmatpush3.msra.mxu0 %v549_v40  ;;  %1106 = vmatpush3.msra.mxu1 %v932_v8 }
  0x34   : > { %1112 = vmatprep.subr.mxu0 %v548_v41  ;;  %1131 = vmatprep.subr.mxu1 %v953_v9 }
  0x35   : > { %1113 = vmatpush3.msra.mxu0 %v548_v41  ;;  %831 = vrot.lane.b32.xlu1 %v1281_v26, %s1174_s27  ;;  %v950_v26 = vld [vmem:[%s1436_s3 + $0xb8] sm:$0xff]  ;;  %v956_v41 = vld [vmem:[%s1437_s4] ss:$0 sm:$0xff] }
  0x36   : > { %1114 = vmatprep.subr.mxu0 %v547_v45 }
  0x37   : > { %1115 = vmatpush3.msra.mxu0 %v547_v45 }
  0x38   : > { %1116 = vmatprep.subr.mxu0 %v546_v48 }
  0x39   : > { %1117 = vmatpush3.msra.mxu0 %v546_v48  ;;  %833 = vrot.lane.b32.xlu1 %v1284_v27, %s1174_s27  ;;  %v949_v27 = vld [vmem:[%s1436_s3 + $0xb0] sm:$0xff] }
  0x3a   : > { %1118 = vmatprep.subr.mxu0 %v545_v50 }
  0x3b   : > { %1119 = vmatpush3.msra.mxu0 %v545_v50 }
  0x3c   : > { %1120 = vmatprep.subr.mxu0 %v544_v54 }
  0x3d   : > { %1121 = vmatpush3.msra.mxu0 %v544_v54 }
  0x3e   : > { %1122 = vmatprep.subr.mxu0 %v543_v57 }
  0x3f   : > { %1123 = vmatpush3.msra.mxu0 %v543_v57 }
  0x40   : > { %1124 = vmatprep.subr.mxu0 %v542_v61 }
  0x41   : > { %1125 = vmatpush3.msra.mxu0 %v542_v61 }
  0x42   : > { %1126 = vmatprep.subr.mxu0 %v541_v3 }
  0x43   : > { %1127 = vmatpush3.msra.mxu0 %v541_v3 }
  0xa7   : > { %v832_v36 = vpop.permute.xlu1 %831 }
  0xab   : > { %v834_v45 = vpop.permute.xlu1 %833 }
  0xdf   : > { %v1046_v46 = vpop.f32.mrf.mxu0  ;;  %v1067_v47 = vpop.f32.mrf.mxu1 }
  0xe0   : > { %v412_v59 = vadd.f32 %v1067_v47, %v1046_v46 }
  0xe1   : > { %v327_v52 = vpop.f32.mrf.mxu0  ;;  %v406_v53 = vpop.f32.mrf.mxu1 }
  0xe2   : > { %v407_v60 = vadd.f32 %v406_v53, %v327_v52 }
  0xf2   : > { %v1088_v55 = vpop.f32.mrf.mxu0 }
  0xf3   : > { %v511_v63 = vadd.f32 %v1088_v55, %v412_v59 }
  0xf4   : > { %v501_v62 = vpop.f32.mrf.mxu0 }
  0xf5   : > { %v510_v1 = vadd.f32 %v501_v62, %v407_v60  ;;  %v520_v6 = vadd.f32 %v931_v0, %v511_v63 }
  0xf7   : > { %v519_v5 = vadd.f32 %v931_v0, %v510_v1  ;;  %v522_v10 = vmax.f32 %v520_v6, 0.0 }
  0xf9   : > { %v521_v7 = vmax.f32 %v519_v5, 0.0 }
  0xfb   : > { %529 = vrot.lane.b32.xlu0 %v521_v7, %s1173_s24 }
  0xff   : > { %531 = vrot.lane.b32.xlu0 %v522_v10, %s1173_s24 }
 0x16d   : > { %v530_v11 = vpop.permute.xlu0 %529 }
 0x16e   : > { %536 = vst.msk [vmem:[#allocation2 + $0x1] sm:$0xff] %vm535_vm4, %v530_v11 }
 0x171   : > { %v532_v12 = vpop.permute.xlu0 %531 }
 0x172   : > { %537 = vst.msk [vmem:[#allocation2 + $0x9] sm:$0xff] %vm535_vm4, %v532_v12 }
 0x175   : > { %v538_v13 = vld [vmem:[#allocation2] sm:$0xff] }
 0x176   : > { %1128 = vmatprep.mubr.msk.f32.mxu0 %vm256_vm1, %v538_v13  ;;  %v563_v16 = vrot.slane %v538_v13, 1  ;;  %v736_v20 = vrot.slane %v538_v13, 2 }
 0x179   : > { %v539_v14 = vld [vmem:[#allocation2 + $0x8] sm:$0xff]  ;;  %v540_v15 = vld [vmem:[#allocation2 + $0x10] sm:$0x3] }
 0x17a   : > { %1129 = vmatmul.mubr.msk.f32.vlgmr.msra.gmra.mxu0 %vm256_vm1, %v539_v14  ;;  %v564_v17 = vrot.slane %v539_v14, 1  ;;  %v566_v18 = vrot.slane %v540_v15, 1  ;;  %v737_v19 = vrot.slane %v539_v14, 2  ;;  %v739_v32 = vrot.slane %v540_v15, 2 }
 0x17c   : > { %v565_v21 = vsel %vm250_vm0, %v563_v16, %v564_v17  ;;  %v567_v22 = vsel %vm250_vm0, %v564_v17, %v566_v18  ;;  %v738_v24 = vsel %vm425_vm2, %v736_v20, %v737_v19  ;;  %v740_v33 = vsel %vm425_vm2, %v737_v19, %v739_v32 }
 0x17d   : > { %1107 = vmatprep.mubr.msk.f32.mxu1 %vm256_vm1, %v565_v21 }
 0x17e   : > { %1108 = vmatmul.mubr.msk.f32.vlgmr.msra.gmra.mxu1 %vm256_vm1, %v567_v22 }
 0x17f   : > { %1132 = vmatpush3.msra.mxu1 %v953_v9  ;;  %1149 = vmatprep.mubr.msk.f32.mxu1 %vm256_vm1, %v738_v24 }
 0x180   : > { %1133 = vmatprep.subr.mxu1 %v952_v23 }
 0x181   : > { %1134 = vmatpush3.msra.mxu1 %v952_v23 }
 0x182   : > { %1135 = vmatprep.subr.mxu1 %v951_v25 }
 0x183   : > { %1136 = vmatpush3.msra.mxu1 %v951_v25 }
 0x184   : > { %1137 = vmatprep.subr.mxu1 %v950_v26 }
 0x185   : > { %1138 = vmatpush3.msra.mxu1 %v950_v26 }
 0x186   : > { %1139 = vmatprep.subr.mxu1 %v949_v27 }
 0x187   : > { %1140 = vmatpush3.msra.mxu1 %v949_v27 }
 0x188   : > { %1141 = vmatprep.subr.mxu1 %v948_v28 }
 0x189   : > { %1142 = vmatpush3.msra.mxu1 %v948_v28 }
 0x18a   : > { %1143 = vmatprep.subr.mxu1 %v947_v29 }
 0x18b   : > { %1144 = vmatpush3.msra.mxu1 %v947_v29 }
 0x18c   : > { %1145 = vmatprep.subr.mxu1 %v946_v30 }
 0x18d   : > { %1146 = vmatpush3.msra.mxu1 %v946_v30 }
 0x18e   : > { %1147 = vmatprep.subr.mxu1 %v945_v31 }
 0x18f   : > { %1148 = vmatpush3.msra.mxu1 %v945_v31 }
 0x190   : > { %1150 = vmatmul.mubr.msk.f32.vlgmr.msra.gmra.mxu1 %vm256_vm1, %v740_v33 }
 0x23a   : > { %v1130_v35 = vpop.f32.mrf.mxu0 }
 0x23c   : > { %v717_v39 = vpop.f32.mrf.mxu0 }
 0x23e   : > { %v1109_v34 = vpop.f32.mrf.mxu1 }
 0x23f   : > { %v723_v38 = vadd.f32 %v1130_v35, %v1109_v34 }
 0x240   : > { %v638_v37 = vpop.f32.mrf.mxu1 }
 0x241   : > { %v718_v42 = vadd.f32 %v717_v39, %v638_v37 }
 0x250   : > { %v1151_v40 = vpop.f32.mrf.mxu1 }
 0x251   : > { %v821_v43 = vadd.f32 %v1151_v40, %v723_v38 }
 0x252   : > { %v811_v44 = vpop.f32.mrf.mxu1 }
 0x253   : > { %v820_v46 = vadd.f32 %v811_v44, %v718_v42  ;;  %v830_v47 = vadd.f32 %v956_v41, %v821_v43 }
 0x255   : > { %v829_v48 = vadd.f32 %v956_v41, %v820_v46  ;;  %v838_v49 = vadd.f32 %v834_v45, %v830_v47 }
 0x257   : > { %v837_v50 = vadd.f32 %v832_v36, %v829_v48  ;;  %v840_v51 = vmax.f32 %v838_v49, 0.0 }
 0x259   : > { %v839_v52 = vmax.f32 %v837_v50, 0.0  ;;  %843 = vst.msk [vmem:[%s224_s26 + $0x8] sm:$0xff] %vm841_vm5, %v840_v51 }
 0x25b   : > { %842 = vst.msk [vmem:[%s224_s26] sm:$0xff] %vm841_vm5, %v839_v52 }
 0x25c PF: > { %s15_s18 = sadd.s32 1, %s1170_s18  }
 0x25d   : > { %p12_p4 = scmp.ge.s32.totalorder %s15_s18, 4  }
 0x25f   :  { %14 = sbr.rel (!%p12_p4) target bundleno = 1 (0x1), region = 74 }

</bundles_post_ra>
